<compile_context>
chip_gen: v5e
topology: v5e:2x2
jax: 0.10.0
libtpu: 0.0.40
codegen_flags: <defaults>
</compile_context>

<pallas_src>
import jax
import jax.numpy as jnp
from jax.experimental import pallas as pl
from jax.experimental.pallas import tpu as pltpu


def _prefix_sum_lanes(v, lane_idx, length):
    """Inclusive prefix sum along the lane (last) axis of a (R, length) tile."""
    acc = v
    shift = 1
    while shift < length:                        # unrolled: log2(length) steps
        rolled = pltpu.roll(acc, shift, axis=1)  # rolled[i] = acc[i - shift] (wraps)
        acc = acc + jnp.where(lane_idx >= shift, rolled, 0.0)
        shift *= 2
    return acc


def make_cln_kernel(n_channels, l_tile, eps):
    def kernel(x_ref, gain_ref, bias_ref, o_ref, carry_ref):
        # Reset the running (sum, sum-of-squares) carry at the start of every
        # batch row.  Correct only because the time axis is innermost+arbitrary.
        @pl.when(pl.program_id(1) == 0)
        def _():
            carry_ref[...] = jnp.zeros_like(carry_ref)

        # Native-dtype load, f32 math.
        x = x_ref[...].astype(jnp.float32)                   # (C, l_tile)

        # Per-time-step statistics (sublane reductions over channels),
        # stacked so the prefix scan runs once over both rows.
        step_sum = jnp.sum(x, axis=0, keepdims=True)          # (1, l_tile)
        step_pow = jnp.sum(x * x, axis=0, keepdims=True)      # (1, l_tile)
        stats = jnp.concatenate([step_sum, step_pow], axis=0)  # (2, l_tile)

        # O(L) Hillis-Steele scan along time (lanes) + carry from prior tiles.
        lane = jax.lax.broadcasted_iota(jnp.int32, (1, l_tile), 1)
        cum = _prefix_sum_lanes(stats, lane, l_tile) + carry_ref[...]  # (2, l_tile)

        # The inclusive scan's last lane is exactly this tile's running total.
        carry_ref[...] = cum[:, l_tile - 1:l_tile]             # (2, 1)

        # Cumulative mean / variance.  Reciprocal on the EUP, rsqrt on the EUP.
        base = pl.program_id(1) * l_tile
        count = ((base + lane + 1) * n_channels).astype(jnp.float32)
        inv_count = pl.reciprocal(count, approx=True)           # (1, l_tile)
        cum_scaled = cum * inv_count                             # (2, l_tile)
        cum_mean = cum_scaled[0:1, :]
        cum_var = cum_scaled[1:2, :] - cum_mean * cum_mean
        cum_var = jnp.maximum(cum_var, 0.0)                      # guard cancellation
        inv_std = jax.lax.rsqrt(cum_var + eps)

        # (C, l_tile): stats broadcast along channels, gain/bias along time.
        o_ref[...] = ((x - cum_mean) * inv_std * gain_ref[...]
                      + bias_ref[...]).astype(o_ref.dtype)

    return kernel


def _round_up(x, m):
    return (x + m - 1) // m * m


def _pick_l_tile(length, channels, itemsize, pipeline_budget_bytes=4 << 20):
    """Largest multiple-of-128 tile whose in+out double-buffers fit the budget."""
    # pipeline bytes ~= 2 (in+out) * 2 (double buffer) * C * l_tile * itemsize
    max_by_vmem = pipeline_budget_bytes // (4 * channels * itemsize)
    max_tile = max(128, min(8192, (max_by_vmem // 128) * 128))
    if length % 128 == 0 and length <= max_tile:
        return length
    if length % 128 == 0:
        # Largest multiple-of-128 divisor of L not exceeding max_tile.
        t = max_tile
        while t >= 128:
            if length % t == 0:
                return t
            t -= 128
    # Otherwise the wrapper pads L up to a multiple of the tile.
    return min(max_tile, _round_up(length, 128))


def cln_forward(x, gain, bias, *, eps=1e-10, l_tile=None):
    """Cumulative layer norm.  x: (B, C, L); gain/bias: (1, C, 1) -> (B, C, L)."""
    B, C, L = x.shape
    out_dtype = x.dtype
    itemsize = jnp.dtype(out_dtype).itemsize
    if l_tile is None:
        l_tile = _pick_l_tile(L, C, itemsize)
    assert l_tile % 128 == 0, l_tile

    # Pad the time axis to a multiple of the tile (lane-dense, VMEM-bounded).
    L_pad = _round_up(L, l_tile)
    x_in = x if L_pad == L else jnp.pad(x, ((0, 0), (0, 0), (0, L_pad - L)))
    n_l = L_pad // l_tile

    gain2 = gain.reshape(C, 1).astype(jnp.float32)
    bias2 = bias.reshape(C, 1).astype(jnp.float32)

    out = pl.pallas_call(
        make_cln_kernel(C, l_tile, eps),
        out_shape=jax.ShapeDtypeStruct((B, C, L_pad), out_dtype),
        grid=(B, n_l),
        in_specs=[
            pl.BlockSpec((None, C, l_tile), lambda b, l: (b, 0, l)),
            pl.BlockSpec((C, 1), lambda b, l: (0, 0)),
            pl.BlockSpec((C, 1), lambda b, l: (0, 0)),
        ],
        out_specs=pl.BlockSpec((None, C, l_tile), lambda b, l: (b, 0, l)),
        scratch_shapes=[pltpu.VMEM((2, 1), jnp.float32)],   # [sum; sum(x^2)] carry
        compiler_params=pltpu.CompilerParams(
            dimension_semantics=("parallel", "arbitrary"),
            vmem_limit_bytes=32 * 1024 * 1024),
    )(x_in, gain2, bias2)

    return out if L_pad == L else out[:, :, :L]


def cln_reference(x, gain, bias, eps=1e-10):
    """Pure-JAX mirror of the PyTorch cLN forward (for verification)."""
    B, C, L = x.shape
    x = x.astype(jnp.float32)
    step_sum = x.sum(axis=1)
    step_pow = (x * x).sum(axis=1)
    cum_sum = jnp.cumsum(step_sum, axis=1)
    cum_pow = jnp.cumsum(step_pow, axis=1)
    count = (jnp.arange(1, L + 1, dtype=jnp.float32) * C).reshape(1, L)
    cum_mean = cum_sum / count
    cum_var = cum_pow / count - cum_mean ** 2
    cum_std = jnp.sqrt(cum_var + eps)
    return (x - cum_mean[:, None, :]) / cum_std[:, None, :] * gain + bias


if __name__ == "__main__":
    key = jax.random.PRNGKey(0)

    configs = [
        # two L tiles: exercises the carried state
        dict(B=2, C=8, L=256, l_tile=128, dtype=jnp.float32, tol=5e-3),
        # non-128-aligned L: exercises the padding path
        dict(B=2, C=4, L=48, l_tile=None, dtype=jnp.float32, tol=5e-3),
        # bf16 end-to-end I/O (f32 math in-kernel)
        dict(B=2, C=16, L=384, l_tile=128, dtype=jnp.bfloat16, tol=5e-2),
    ]
    for cfg in configs:
        B, C, L = cfg["B"], cfg["C"], cfg["L"]
        key, xk, gk, bk = jax.random.split(key, 4)
        x = jax.random.normal(xk, (B, C, L), jnp.float32)
        gain = 1.0 + 0.1 * jax.random.normal(gk, (1, C, 1), jnp.float32)
        bias = 0.1 * jax.random.normal(bk, (1, C, 1), jnp.float32)

        x_in = x.astype(cfg["dtype"])
        y = cln_forward(x_in, gain, bias, l_tile=cfg["l_tile"])
        y = jax.block_until_ready(y)
        assert y.dtype == cfg["dtype"], y.dtype
        assert y.shape == (B, C, L), y.shape

        y_ref = cln_reference(x_in, gain, bias)
        max_err = float(jnp.max(jnp.abs(y.astype(jnp.float32) - y_ref)))
        assert max_err < cfg["tol"], (
            f"mismatch (B={B},C={C},L={L},{cfg['dtype'].__name__}): "
            f"max abs err = {max_err}")

    print("KERNEL_OK")
</pallas_src>

<mosaic_0001>
module attributes {stable_mosaic.version = 11 : i64} {
  func.func @kernel(%arg0: i32, %arg1: i32, %arg2: memref<1x8x128xf32, #tpu.memory_space<vmem>>, %arg3: memref<8x1xf32, #tpu.memory_space<vmem>>, %arg4: memref<8x1xf32, #tpu.memory_space<vmem>>, %arg5: memref<1x8x128xf32, #tpu.memory_space<vmem>>, %arg6: memref<2x1xf32, #tpu.memory_space<vmem>>) attributes {dimension_semantics = [#tpu.dimension_semantics<parallel>, #tpu.dimension_semantics<arbitrary>], iteration_bounds = array<i64: 2, 2>, scalar_prefetch = 0 : i64, scratch_operands = 1 : i64, tpu.core_type = #tpu.core_type<tc>, window_params = [{transform_indices = @transform_0, window_bounds = array<i64: 1, 8, 128>}, {pipeline_mode = #tpu.pipeline_mode<synchronous>, transform_indices = @transform_1, window_bounds = array<i64: 8, 1>}, {pipeline_mode = #tpu.pipeline_mode<synchronous>, transform_indices = @transform_2, window_bounds = array<i64: 8, 1>}, {transform_indices = @transform_3, window_bounds = array<i64: 1, 8, 128>}]} {
    %c0_i32 = arith.constant 0 : i32
    %0 = arith.cmpi eq, %arg1, %c0_i32 : i32
    %1 = arith.extui %0 : i1 to i32
    %c0_i32_0 = arith.constant 0 : i32
    %2 = arith.cmpi ne, %1, %c0_i32_0 : i32
    scf.if %2 {
      %cst_33 = arith.constant 0.000000e+00 : f32
      %106 = vector.broadcast %cst_33 : f32 to vector<2x1xf32>
      %c0_34 = arith.constant 0 : index
      %c0_35 = arith.constant 0 : index
      %107 = vector.load %arg6[%c0_34, %c0_35] : memref<2x1xf32, #tpu.memory_space<vmem>>, vector<2x1xf32>
      tpu.vector_store %arg6[%c0_34, %c0_35], %106 {strides = array<i32>} : memref<2x1xf32, #tpu.memory_space<vmem>>, vector<2x1xf32>,
    } else {
    }
    %c0 = arith.constant 0 : index
    %c0_1 = arith.constant 0 : index
    %c0_2 = arith.constant 0 : index
    %3 = vector.load %arg2[%c0, %c0_1, %c0_2] : memref<1x8x128xf32, #tpu.memory_space<vmem>>, vector<1x8x128xf32>
    %4 = vector.shape_cast %3 : vector<1x8x128xf32> to vector<8x128xf32>
    %cst = arith.constant dense<0.000000e+00> : vector<128xf32>
    %5 = vector.multi_reduction <add>, %4, %cst [0] : vector<8x128xf32> to vector<128xf32>
    %6 = vector.shape_cast %5 : vector<128xf32> to vector<1x128xf32>
    %7 = arith.mulf %4, %4 : vector<8x128xf32>
    %cst_3 = arith.constant dense<0.000000e+00> : vector<128xf32>
    %8 = vector.multi_reduction <add>, %7, %cst_3 [0] : vector<8x128xf32> to vector<128xf32>
    %9 = vector.shape_cast %8 : vector<128xf32> to vector<1x128xf32>
    %10 = tpu.concatenate %6, %9 in 0 : vector<1x128xf32>, vector<1x128xf32> -> vector<2x128xf32>
    %11 = tpu.iota {dimensions = array<i32: 1>} : vector<1x128xi32>
    %c1_i32 = arith.constant 1 : i32
    %12 = tpu.dynamic_rotate %10 by %c1_i32 dim 1 : vector<2x128xf32>, i32 -> vector<2x128xf32>
    %c1_i32_4 = arith.constant 1 : i32
    %13 = vector.broadcast %c1_i32_4 : i32 to vector<1x128xi32>
    %14 = arith.cmpi sge, %11, %13 : vector<1x128xi32>
    %cst_5 = arith.constant 0.000000e+00 : f32
    %15 = vector.shape_cast %14 : vector<1x128xi1> to vector<1x128xi1>
    %16 = vector.broadcast %15 : vector<1x128xi1> to vector<2x128xi1>
    %17 = vector.broadcast %cst_5 : f32 to vector<2x128xf32>
    %18 = arith.select %16, %12, %17 : vector<2x128xi1>, vector<2x128xf32>
    %19 = arith.addf %10, %18 : vector<2x128xf32>
    %c2_i32 = arith.constant 2 : i32
    %20 = tpu.dynamic_rotate %19 by %c2_i32 dim 1 : vector<2x128xf32>, i32 -> vector<2x128xf32>
    %c2_i32_6 = arith.constant 2 : i32
    %21 = vector.broadcast %c2_i32_6 : i32 to vector<1x128xi32>
    %22 = arith.cmpi sge, %11, %21 : vector<1x128xi32>
    %cst_7 = arith.constant 0.000000e+00 : f32
    %23 = vector.shape_cast %22 : vector<1x128xi1> to vector<1x128xi1>
    %24 = vector.broadcast %23 : vector<1x128xi1> to vector<2x128xi1>
    %25 = vector.broadcast %cst_7 : f32 to vector<2x128xf32>
    %26 = arith.select %24, %20, %25 : vector<2x128xi1>, vector<2x128xf32>
    %27 = arith.addf %19, %26 : vector<2x128xf32>
    %c4_i32 = arith.constant 4 : i32
    %28 = tpu.dynamic_rotate %27 by %c4_i32 dim 1 : vector<2x128xf32>, i32 -> vector<2x128xf32>
    %c4_i32_8 = arith.constant 4 : i32
    %29 = vector.broadcast %c4_i32_8 : i32 to vector<1x128xi32>
    %30 = arith.cmpi sge, %11, %29 : vector<1x128xi32>
    %cst_9 = arith.constant 0.000000e+00 : f32
    %31 = vector.shape_cast %30 : vector<1x128xi1> to vector<1x128xi1>
    %32 = vector.broadcast %31 : vector<1x128xi1> to vector<2x128xi1>
    %33 = vector.broadcast %cst_9 : f32 to vector<2x128xf32>
    %34 = arith.select %32, %28, %33 : vector<2x128xi1>, vector<2x128xf32>
    %35 = arith.addf %27, %34 : vector<2x128xf32>
    %c8_i32 = arith.constant 8 : i32
    %36 = tpu.dynamic_rotate %35 by %c8_i32 dim 1 : vector<2x128xf32>, i32 -> vector<2x128xf32>
    %c8_i32_10 = arith.constant 8 : i32
    %37 = vector.broadcast %c8_i32_10 : i32 to vector<1x128xi32>
    %38 = arith.cmpi sge, %11, %37 : vector<1x128xi32>
    %cst_11 = arith.constant 0.000000e+00 : f32
    %39 = vector.shape_cast %38 : vector<1x128xi1> to vector<1x128xi1>
    %40 = vector.broadcast %39 : vector<1x128xi1> to vector<2x128xi1>
    %41 = vector.broadcast %cst_11 : f32 to vector<2x128xf32>
    %42 = arith.select %40, %36, %41 : vector<2x128xi1>, vector<2x128xf32>
    %43 = arith.addf %35, %42 : vector<2x128xf32>
    %c16_i32 = arith.constant 16 : i32
    %44 = tpu.dynamic_rotate %43 by %c16_i32 dim 1 : vector<2x128xf32>, i32 -> vector<2x128xf32>
    %c16_i32_12 = arith.constant 16 : i32
    %45 = vector.broadcast %c16_i32_12 : i32 to vector<1x128xi32>
    %46 = arith.cmpi sge, %11, %45 : vector<1x128xi32>
    %cst_13 = arith.constant 0.000000e+00 : f32
    %47 = vector.shape_cast %46 : vector<1x128xi1> to vector<1x128xi1>
    %48 = vector.broadcast %47 : vector<1x128xi1> to vector<2x128xi1>
    %49 = vector.broadcast %cst_13 : f32 to vector<2x128xf32>
    %50 = arith.select %48, %44, %49 : vector<2x128xi1>, vector<2x128xf32>
    %51 = arith.addf %43, %50 : vector<2x128xf32>
    %c32_i32 = arith.constant 32 : i32
    %52 = tpu.dynamic_rotate %51 by %c32_i32 dim 1 : vector<2x128xf32>, i32 -> vector<2x128xf32>
    %c32_i32_14 = arith.constant 32 : i32
    %53 = vector.broadcast %c32_i32_14 : i32 to vector<1x128xi32>
    %54 = arith.cmpi sge, %11, %53 : vector<1x128xi32>
    %cst_15 = arith.constant 0.000000e+00 : f32
    %55 = vector.shape_cast %54 : vector<1x128xi1> to vector<1x128xi1>
    %56 = vector.broadcast %55 : vector<1x128xi1> to vector<2x128xi1>
    %57 = vector.broadcast %cst_15 : f32 to vector<2x128xf32>
    %58 = arith.select %56, %52, %57 : vector<2x128xi1>, vector<2x128xf32>
    %59 = arith.addf %51, %58 : vector<2x128xf32>
    %c64_i32 = arith.constant 64 : i32
    %60 = tpu.dynamic_rotate %59 by %c64_i32 dim 1 : vector<2x128xf32>, i32 -> vector<2x128xf32>
    %c64_i32_16 = arith.constant 64 : i32
    %61 = vector.broadcast %c64_i32_16 : i32 to vector<1x128xi32>
    %62 = arith.cmpi sge, %11, %61 : vector<1x128xi32>
    %cst_17 = arith.constant 0.000000e+00 : f32
    %63 = vector.shape_cast %62 : vector<1x128xi1> to vector<1x128xi1>
    %64 = vector.broadcast %63 : vector<1x128xi1> to vector<2x128xi1>
    %65 = vector.broadcast %cst_17 : f32 to vector<2x128xf32>
    %66 = arith.select %64, %60, %65 : vector<2x128xi1>, vector<2x128xf32>
    %67 = arith.addf %59, %66 : vector<2x128xf32>
    %c0_18 = arith.constant 0 : index
    %c0_19 = arith.constant 0 : index
    %68 = vector.load %arg6[%c0_18, %c0_19] : memref<2x1xf32, #tpu.memory_space<vmem>>, vector<2x1xf32>
    %69 = vector.broadcast %68 : vector<2x1xf32> to vector<2x128xf32>
    %70 = arith.addf %67, %69 : vector<2x128xf32>
    %71 = vector.extract_strided_slice %70 {offsets = [0, 127], sizes = [2, 1], strides = [1, 1]} : vector<2x128xf32> to vector<2x1xf32>
    %c0_20 = arith.constant 0 : index
    %c0_21 = arith.constant 0 : index
    %72 = vector.load %arg6[%c0_20, %c0_21] : memref<2x1xf32, #tpu.memory_space<vmem>>, vector<2x1xf32>
    tpu.vector_store %arg6[%c0_20, %c0_21], %71 {strides = array<i32>} : memref<2x1xf32, #tpu.memory_space<vmem>>, vector<2x1xf32>,
    %c128_i32 = arith.constant 128 : i32
    %73 = arith.muli %arg1, %c128_i32 : i32
    %74 = vector.broadcast %73 : i32 to vector<1x128xi32>
    %75 = arith.addi %74, %11 : vector<1x128xi32>
    %c1_i32_22 = arith.constant 1 : i32
    %76 = vector.broadcast %c1_i32_22 : i32 to vector<1x128xi32>
    %77 = arith.addi %75, %76 : vector<1x128xi32>
    %c8_i32_23 = arith.constant 8 : i32
    %78 = vector.broadcast %c8_i32_23 : i32 to vector<1x128xi32>
    %79 = arith.muli %77, %78 : vector<1x128xi32>
    %80 = arith.sitofp %79 : vector<1x128xi32> to vector<1x128xf32>
    %81 = tpu.reciprocal %80 {approx = true} : vector<1x128xf32> -> vector<1x128xf32>
    %82 = vector.broadcast %81 : vector<1x128xf32> to vector<2x128xf32>
    %83 = arith.mulf %70, %82 : vector<2x128xf32>
    %84 = vector.extract_strided_slice %83 {offsets = [0, 0], sizes = [1, 128], strides = [1, 1]} : vector<2x128xf32> to vector<1x128xf32>
    %85 = vector.extract_strided_slice %83 {offsets = [1, 0], sizes = [1, 128], strides = [1, 1]} : vector<2x128xf32> to vector<1x128xf32>
    %86 = arith.mulf %84, %84 : vector<1x128xf32>
    %87 = arith.subf %85, %86 : vector<1x128xf32>
    %cst_24 = arith.constant 0.000000e+00 : f32
    %88 = vector.broadcast %cst_24 : f32 to vector<1x128xf32>
    %89 = arith.maximumf %87, %88 : vector<1x128xf32>
    %cst_25 = arith.constant 1.000000e-10 : f32
    %90 = vector.broadcast %cst_25 : f32 to vector<1x128xf32>
    %91 = arith.addf %89, %90 : vector<1x128xf32>
    %92 = math.rsqrt %91 : vector<1x128xf32>
    %93 = vector.broadcast %84 : vector<1x128xf32> to vector<8x128xf32>
    %94 = arith.subf %4, %93 : vector<8x128xf32>
    %95 = vector.broadcast %92 : vector<1x128xf32> to vector<8x128xf32>
    %96 = arith.mulf %94, %95 : vector<8x128xf32>
    %c0_26 = arith.constant 0 : index
    %c0_27 = arith.constant 0 : index
    %97 = vector.load %arg3[%c0_26, %c0_27] : memref<8x1xf32, #tpu.memory_space<vmem>>, vector<8x1xf32>
    %98 = vector.broadcast %97 : vector<8x1xf32> to vector<8x128xf32>
    %99 = arith.mulf %96, %98 : vector<8x128xf32>
    %c0_28 = arith.constant 0 : index
    %c0_29 = arith.constant 0 : index
    %100 = vector.load %arg4[%c0_28, %c0_29] : memref<8x1xf32, #tpu.memory_space<vmem>>, vector<8x1xf32>
    %101 = vector.broadcast %100 : vector<8x1xf32> to vector<8x128xf32>
    %102 = arith.addf %99, %101 : vector<8x128xf32>
    %c0_30 = arith.constant 0 : index
    %c0_31 = arith.constant 0 : index
    %c0_32 = arith.constant 0 : index
    %103 = vector.load %arg5[%c0_30, %c0_31, %c0_32] : memref<1x8x128xf32, #tpu.memory_space<vmem>>, vector<1x8x128xf32>
    %104 = vector.shape_cast %103 : vector<1x8x128xf32> to vector<8x128xf32>
    %105 = vector.shape_cast %102 : vector<8x128xf32> to vector<1x8x128xf32>
    tpu.vector_store %arg5[%c0_30, %c0_31, %c0_32], %105 {strides = array<i32>} : memref<1x8x128xf32, #tpu.memory_space<vmem>>, vector<1x8x128xf32>,
    return
  }
  func.func @transform_0(%arg0: i32, %arg1: i32) -> (i32, i32, i32) {
    %c0_i32 = arith.constant 0 : i32
    %c0_i32_0 = arith.constant 0 : i32
    return %arg0, %c0_i32, %arg1 : i32, i32, i32
  }
  func.func @transform_1(%arg0: i32, %arg1: i32) -> (i32, i32) {
    %c0_i32 = arith.constant 0 : i32
    %c0_i32_0 = arith.constant 0 : i32
    %c0_i32_1 = arith.constant 0 : i32
    return %c0_i32, %c0_i32_0 : i32, i32
  }
  func.func @transform_2(%arg0: i32, %arg1: i32) -> (i32, i32) {
    %c0_i32 = arith.constant 0 : i32
    %c0_i32_0 = arith.constant 0 : i32
    %c0_i32_1 = arith.constant 0 : i32
    return %c0_i32, %c0_i32_0 : i32, i32
  }
  func.func @transform_3(%arg0: i32, %arg1: i32) -> (i32, i32, i32) {
    %c0_i32 = arith.constant 0 : i32
    %c0_i32_0 = arith.constant 0 : i32
    return %arg0, %c0_i32, %arg1 : i32, i32, i32
  }
}

</mosaic_0001>

<bundles_post_ra>
// kernel: tpu_custom_call.1
= control target key start
LH: loop header
LB: loop body
LE: loop exit
PB: predicated region body
PF: predicated region fallthrough
CT: control target
= control target key end

     0   :  { %8 = vsyncpa [#allocation4], 0  ;;  %s872_s0 = inlined_call_operand.hbm [shape: f32[2,8,256], index: 0, kind: input, shape index: {}]   ;;  %s873_s1 = inlined_call_operand.vmem [shape: f32[8,1], index: 1, kind: input, shape index: {}]   ;;  %s874_s2 = inlined_call_operand.vmem [shape: f32[8,1], index: 2, kind: input, shape index: {}]   ;;  %s875_s3 = inlined_call_operand.hbm [shape: f32[2,8,256], index: 3, kind: output, shape index: {}]  }
   0x1   :  { %10 = vsyncpa [#allocation4 + $0x1], 0 }
   0x2   :  { %11 = vsyncpa [#allocation5], 0 }
   0x3   :  { %13 = vsyncpa [#allocation5 + $0x1], 0  ;;  %s709_s12 = smov 0   ;;  %s711_s13 = smov 0  }
   0x4   :  { %s713_s14 = smov 0   ;;  %s715_s15 = smov 0  }
   0x5   :  { %s717_s16 = smov 0   ;;  %s719_s17 = smov 0  }
   0x6   :  { %s721_s18 = smov 0   ;;  %s723_s19 = smov 0  }
   0x7 LB: > { %s439_s20 = sadd.s32 4294967295, %s678_s19   ;;  %s440_s21 = sadd.s32 4294967294, %s678_s19   ;;  %s678_s19 = sphi %s723_s19, %s19_s19   ;;  %s674_s18 = sphi %s721_s18, %s889_s18   ;;  %s670_s17 = sphi %s719_s17, %s888_s17   ;;  %s666_s16 = sphi %s717_s16, %s887_s16   ;;  %s662_s15 = sphi %s715_s15, %s886_s15   ;;  %s658_s14 = sphi %s713_s14, %s885_s14   ;;  %s654_s13 = sphi %s711_s13, %s884_s13   ;;  %s650_s12 = sphi %s709_s12, %s883_s12  }
   0x8   : > { %s28_s22 = sadd.s32 1, %s670_s17  ;;  %s31_s23 = sadd.s32 1, %s674_s18 }
   0x9   : > { %p29_p0 = scmp.ge.s32.totalorder %s28_s22, 2  ;;  %s40_s24 = sadd.s32 1, %s658_s14 }
   0xa   : > { %p47_p1 = scmp.ne.s32.totalorder %s658_s14, %s654_s13  ;;  %p48_p2 = scmp.eq.s32.totalorder %s678_s19, 0 }
   0xb   : > { %s891_s22 = smov (%p29_p0, %s28_s22), 0  ;;  %s893_s23 = smov (!%p29_p0, %s31_s23), %s674_s18 }
   0xc   : > { %s36_s25 = ssub.s32 %s670_s17, %s891_s22  ;;  %p762_p3 = por %p48_p2, %p47_p1 }
   0xd   : > { %p33_p4 = scmp.ge.s32.totalorder %s893_s23, 2  ;;  %p53_p5 = scmp.ne.s32.totalorder %s654_s13, %s650_s12 }
   0xe   : > { %p54_p6 = scmp.eq.s32.totalorder %s439_s20, 0  ;;  %p121_p7 = scmp.eq.s32.totalorder %s439_s20, 3 }
   0xf   : > { %s895_s23 = smov (%p33_p4, %s893_s23), 0  ;;  %p127_p10 = scmp.eq.s32.totalorder %s440_s21, 3 }
  0x10   : > { %878 = sst [smem:[#allocation9_spill]] %s895_s23  ;;  %p770_p8 = por %p54_p6, %p53_p5 }
  0x11   : > { %p774_p9 = por %p121_p7, %p47_p1  ;;  %s35_s29 = ssub.s32 %s674_s18, %s895_s23 }
  0x12   : > { %s37_s30 = sor.u32 %s36_s25, %s35_s29  ;;  %p780_p12 = por %p127_p10, %p53_p5 }
  0x13   : > { %p38_p11 = scmp.eq.s32.totalorder %s37_s30, 0  ;;  %p468_p13 = scmp.lt.s32.totalorder %s678_s19, 4 }
  0x14   : > { %s153_s5 = sand.u32 1, %s658_s14   ;;  %s444_s8 = sshll.u32 %s674_s18, 1 }
  0x15   : > { %s787_s6 = scalar_select %p38_p11, %s658_s14, %s40_s24  }
  0x16   : > { %s443_s7 = sshll.u32 %s153_s5, 3  ;;  %s161_s9 = sadd.s32 %s670_s17, %s444_s8 }
  0x17   : > { %s157_s10 = scalar_lea.vmem [#allocation3], %s443_s7  ;;  %s445_s20 = sshll.u32 %s161_s9, 3 }
  0x18   : > { %s167_s11 = sshll.u32 %s157_s10, 4  ;;  %s163_s29 = scalar_lea.hbm %s872_s0, %s445_s20  ;;  %s168_s11 = int_to_ptr.vmem [resolvable:$true] %s167_s11 }
  0x19   : > { %p461_p0 = pnand %p468_p13, %p762_p3  ;;  %s165_s30 = sshll.u32 %s163_s29, 4  ;;  %s166_s30 = int_to_ptr.hbm [resolvable:$true] %s165_s30 }
  0x1a   : > { %p446_p1 = scmp.ge.s32.totalorder %s678_s19, 1  ;;  %s154_s23 = scalar_lea.sflag [#allocation4], %s153_s5 }
  0x1b   : > { %463 = dma.hbm_to_vmem [thread:$0]  (!%p461_p0), %s166_s30, 128, %s168_s11, %s154_s23  }
  0x1c   : > { %p172_p2 = scmp.lt.s32.totalorder %s678_s19, 5 }
  0x1e   : > { %p173_p4 = pnand %p446_p1, %p172_p2 }
  0x1f   : > { %s799_s24 = sand.u32 (!%p173_p4), 1, %s654_s13  }
  0x20   : > { %176 = sbr.rel (%p173_p4) target bundleno = 959 (0x3bf), region = 32  ;;  %s447_s7 = sshll.u32 (!%p173_p4), %s799_s24, 3 }
  0x21   : > { %s179_s8 = scalar_lea.sflag (!%p173_p4), [#allocation4], %s799_s24  ;;  %s182_s9 = scalar_lea.vmem (!%p173_p4), [#allocation3], %s447_s7 }
  0x25   : > { %641 = dma.done.wait (%p770_p8), %s179_s8, 128  }
  0x26   : > { %643 = vsyncadd (%p770_p8), %s179_s8, 4294967168  ;;  %s807_s26 = scalar_lea.vmem [#allocation6], %s447_s7  ;;  %p449_p3 = scmp.ne.s32.totalorder %s662_s15, 0 }
  0x28   : > { %209 = sbr.rel (%p449_p3) target bundleno = 47 (0x2f), region = 40 }
  0x2d   : > { %vm210_vm0 = vcmask 1024   ;;  %v680_v0 = vmov 0.0  }
  0x2e   : > { %211 = vst.msk [vmem:[#allocation2] sm:$0x3] %vm210_vm0, %v680_v0 }
  0x2f PF: > { %v810_v1 = vld [vmem:[%s182_s9] sm:$0xff]  ;;  %vm226_vm1 = vcmask 1040384   ;;  %s681_s23 = smov 1   ;;  %v228_v16 = vlaneseq  ;;  %s682_s27 = smov 2   ;;  %v687_v34 = vmov 0  }
  0x30   : > { %v213_v2 = vrot.slane %v810_v1, 4  ;;  %v219_v3 = vmul.f32 %v810_v1, %v810_v1  ;;  %s683_s5 = smov 4   ;;  %s684_s10 = smov 8   ;;  %543 = vset.pattern.permute.xlu1 %v687_v34  ;;  %545 = vset.pattern.permute.xlu0 %v687_v34  ;;  %v321_v35 = vld [vmem:[%s873_s1] sm:$0xff] }
  0x31   : > { %v229_v17 = vand.u32 127, %v228_v16  ;;  %s685_s11 = smov 16   ;;  %s686_s20 = smov 32   ;;  %544 = vset.pattern.permute.xlu2 %v687_v34  ;;  %v328_v39 = vld [vmem:[%s874_s2] sm:$0xff] }
  0x32   : > { %v214_v4 = vadd.f32 %v213_v2, %v810_v1  ;;  %v220_v5 = vrot.slane %v219_v3, 4  ;;  %s688_s29 = smov 64   ;;  %s450_s8 = sshll.u32 %s662_s15, 7 }
  0x33   : > { %vm232_vm2 = vcmp.ge.s32.totalorder %v229_v17, 1  ;;  %vm239_vm3 = vcmp.ge.s32.totalorder %v229_v17, 2  ;;  %vm246_vm4 = vcmp.ge.s32.totalorder %v229_v17, 4  ;;  %vm253_vm5 = vcmp.ge.s32.totalorder %v229_v17, 8  ;;  %s452_s9 = sshll.u32 %s666_s16, 1  ;;  %s600_s7 = scalar_lea.hbm %s875_s3, 32 }
  0x34   : > { %v215_v6 = vrot.slane %v214_v4, 2  ;;  %v221_v7 = vadd.f32 %v220_v5, %v219_v3  ;;  %vm260_vm6 = vcmp.ge.s32.totalorder %v229_v17, 16  ;;  %vm267_vm7 = vcmp.ge.s32.totalorder %v229_v17, 32 }
  0x35   : > { %v279_v33 = vld [vmem:[#allocation2] sm:$0x3]  ;;  %v293_v40 = vstv %s450_s8  ;;  %vm274_vm8 = vcmp.ge.s32.totalorder %v229_v17, 64 }
  0x36   : > { %v216_v8 = vadd.f32 %v215_v6, %v214_v4  ;;  %v222_v9 = vrot.slane %v221_v7, 2  ;;  %v294_v41 = vadd.s32 %v293_v40, %v229_v17 }
  0x38   : > { %v217_v10 = vrot.slane %v216_v8, 1  ;;  %v223_v11 = vadd.f32 %v222_v9, %v221_v7  ;;  %v295_v42 = vadd.s32 1, %v294_v41 }
  0x3a   : > { %v218_v12 = vadd.f32 %v217_v10, %v216_v8  ;;  %v224_v13 = vrot.slane %v223_v11, 1  ;;  %v296_v43 = vmul.u32 8, %v295_v42 }
  0x3c   : > { %v225_v14 = vadd.f32 %v224_v13, %v223_v11  ;;  %v297_v44 = vcvt.s32.f32 %v296_v43 }
  0x3e   : > { %v227_v15 = vsel %vm226_vm1, %v218_v12, %v225_v14  ;;  %546 = vrcp.f32 %v297_v44 }
  0x3f   : > { %230 = vrot.lane.b32.xlu0 %v227_v15, %s681_s23 }
  0x44   : > { %v547_v49 = vpop.eup %546 }
  0xb1   : > { %v231_v18 = vpop.permute.xlu0 %230 }
  0xb2   : > { %v235_v19 = vsel %vm232_vm2, %v231_v18, 0.0 }
  0xb3   : > { %v236_v20 = vadd.f32 %v235_v19, %v227_v15 }
  0xb5   : > { %237 = vrot.lane.b32.xlu0 %v236_v20, %s682_s27  ;;  %s347_s27 = sadd.s32 %s662_s15, %s452_s9  ;;  %s351_s15 = sshll.u32 %s807_s26, 4  ;;  %s352_s15 = int_to_ptr.vmem [resolvable:$true] %s351_s15 }
 0x127   : > { %v238_v21 = vpop.permute.xlu0 %237 }
 0x128   : > { %v242_v22 = vsel %vm239_vm3, %v238_v21, 0.0 }
 0x129   : > { %v243_v23 = vadd.f32 %v242_v22, %v236_v20 }
 0x12b   : > { %244 = vrot.lane.b32.xlu1 %v243_v23, %s683_s5 }
 0x19d   : > { %v245_v24 = vpop.permute.xlu1 %244 }
 0x19e   : > { %v249_v25 = vsel %vm246_vm4, %v245_v24, 0.0 }
 0x19f   : > { %v250_v26 = vadd.f32 %v249_v25, %v243_v23 }
 0x1a1   : > { %251 = vrot.lane.b32.xlu1 %v250_v26, %s684_s10 }
 0x1a9   : > { %282 = vperm.xlu1 %543, %v279_v33  }
 0x213   : > { %v252_v27 = vpop.permute.xlu1 %251 }
 0x214   : > { %v256_v28 = vsel %vm253_vm5, %v252_v27, 0.0 }
 0x215   : > { %v257_v29 = vadd.f32 %v256_v28, %v250_v26 }
 0x217   : > { %258 = vrot.lane.b32.xlu2 %v257_v29, %s685_s11 }
 0x21b   : > { %v283_v47 = vpop.permute.xlu1 %282 }
 0x271   : > { %v259_v30 = vpop.permute.xlu2 %258 }
 0x272   : > { %v263_v31 = vsel %vm260_vm6, %v259_v30, 0.0 }
 0x273   : > { %v264_v32 = vadd.f32 %v263_v31, %v257_v29 }
 0x275   : > { %265 = vrot.lane.b32.xlu2 %v264_v32, %s686_s20  ;;  %s337_s20 = scalar_lea.sflag [#allocation5], %s799_s24 }
 0x27d   : > { %324 = vperm.xlu2 %544, %v321_v35  }
 0x2cf   : > { %v266_v36 = vpop.permute.xlu2 %265 }
 0x2d0   : > { %v270_v37 = vsel %vm267_vm7, %v266_v36, 0.0 }
 0x2d1   : > { %v271_v38 = vadd.f32 %v270_v37, %v264_v32 }
 0x2d3   : > { %272 = vrot.lane.b32.xlu0 %v271_v38, %s688_s29 }
 0x2d7   : > { %v325_v4 = vpop.permute.xlu2 %324 }
 0x2db   : > { %331 = vperm.xlu0 %545, %v328_v39  }
 0x345   : > { %v273_v45 = vpop.permute.xlu0 %272 }
 0x346   : > { %v277_v46 = vsel %vm274_vm8, %v273_v45, 0.0 }
 0x347   : > { %v278_v48 = vadd.f32 %v277_v46, %v271_v38 }
 0x349   : > { %v285_v50 = vadd.f32 %v283_v47, %v278_v48 }
 0x34b   : > { %v299_v51 = vmul.f32 %v547_v49, %v285_v50  ;;  %287 = vrot.lane.b32.xlu1 %v285_v50, %s681_s23  ;;  %s453_s23 = sshll.u32 %s347_s27, 3 }
 0x34c   : > { %s349_s16 = scalar_lea.hbm %s875_s3, %s453_s23 }
 0x34d   : > { %v300_v52 = vmul.f32 %v299_v51, %v299_v51  ;;  %v317_v62 = vperm.slane %v299_v51, 0  ;;  %v332_v6 = vpop.permute.xlu0 %331  ;;  %s353_s11 = sshll.u32 %s349_s16, 4  ;;  %s354_s11 = int_to_ptr.hbm [resolvable:$true] %s353_s11 }
 0x34e   : > { %s594_s21 = sshra.s32 %s354_s11, 4  ;;  %s595_s21 = int_to_ptr.hbm [resolvable:$true] %s594_s21 }
 0x34f   : > { %v302_v53 = vrot.slane %v300_v52, 7  ;;  %v318_v2 = vsub.f32 %v810_v1, %v317_v62  ;;  %s596_s25 = scalar_lea.hbm %s595_s21, 8  ;;  %p601_p8 = scmp.lt.s32.totalorder %s595_s21, %s875_s3 }
 0x350   : > { %p597_p5 = scmp.ne.s32.totalorder %s595_s21, %s596_s25  ;;  %p602_p10 = scmp.lt.s32.totalorder %s600_s7, %s596_s25 }
 0x351   : > { %v304_v54 = vsub.f32 %v299_v51, %v302_v53 }
 0x352   : > { %p598_p6 = pnand %p597_p5, %p774_p9  ;;  %p603_p11 = por %p602_p10, %p601_p8 }
 0x353   : > { %v305_v55 = vmax.f32 %v304_v54, 0.0 }
 0x354   : > { %p599_p7 = pneg %p598_p6 }
 0x355   : > { %v306_v56 = vadd.f32 1e-10, %v305_v55 }
 0x356   : > { %p604_p13 = pnand %p603_p11, %p599_p7 }
 0x357   : > { %548 = vrsqrt.f32 %v306_v56  ;;  %vm313_vm10 = vweird.f32 %v306_v56 }
 0x35d   : > { %v549_v57 = vpop.eup %548 }
 0x35e   : > { %v308_v58 = vmul.f32 %v549_v57, %v306_v56  ;;  %vm314_vm9 = vweird.f32 %v549_v57 }
 0x35f   : > { %vm315_vm11 = vmor %vm313_vm10, %vm314_vm9 }
 0x360   : > { %v309_v59 = vmul.f32 %v549_v57, %v308_v58 }
 0x362   : > { %v310_v60 = vmul.f32 0.5, %v309_v59 }
 0x364   : > { %v311_v61 = vsub.f32 1.5, %v310_v60 }
 0x366   : > { %v312_v63 = vmul.f32 %v549_v57, %v311_v61 }
 0x368   : > { %v316_v0 = vsel %vm315_vm11, %v549_v57, %v312_v63 }
 0x369   : > { %v319_v3 = vperm.slane %v316_v0, 1 }
 0x36b   : > { %v320_v5 = vmul.f32 %v319_v3, %v318_v2 }
 0x36d   : > { %v327_v7 = vmul.f32 %v325_v4, %v320_v5 }
 0x36f   : > { %v334_v8 = vadd.f32 %v332_v6, %v327_v7 }
 0x371   : > { %335 = vst [vmem:[%s807_s26] sm:$0xff] %v334_v8 }
 0x372   : > { %607 = shalt.err (!%p604_p13)
}
 0x373   : > { %458 = dma.vmem_to_hbm [thread:$0]  (%p774_p9), %s352_s15, 128, %s354_s11, %s337_s20   ;;  %vm290_vm12 = vcmask 1024  }
 0x3bd   : > { %v288_v1 = vpop.permute.xlu1 %287 }
 0x3be   : > { %291 = vst.msk [vmem:[#allocation2] sm:$0x3] %vm290_vm12, %v288_v1 }
 0x3bf PF: > { %p469_p0 = scmp.ge.s32.totalorder %s678_s19, 2  ;;  %s365_s24 = sand.u32 1, %s650_s12  }
 0x3c0   : > { %s366_s26 = scalar_lea.sflag [#allocation5], %s365_s24 }
 0x3c1   : > { %p465_p1 = pnand %p469_p0, %p780_p12 }
 0x3c3   : > { %p466_p2 = pneg %p465_p1 }
 0x3c5   : > { %645 = dma.done.wait (%p466_p2), %s366_s26, 128  }
 0x3c6   : > { %647 = vsyncadd (%p466_p2), %s366_s26, 4294967168  ;;  %s19_s19 = sadd.s32 1, %s678_s19   ;;  %s882_s28 = sld [smem:[#allocation9_spill]] }
 0x3c7   : > { %p16_p4 = scmp.ge.s32.totalorder %s19_s19, 6   ;;  %s883_s12 = smov %s654_s13 }
 0x3c8   : > { %s884_s13 = smov %s658_s14  ;;  %s885_s14 = smov %s787_s6 }
 0x3c9   : > { %s886_s15 = smov %s670_s17  ;;  %s887_s16 = smov %s674_s18 }
 0x3ca   : > { %s888_s17 = smov %s891_s22  ;;  %18 = sbr.rel (!%p16_p4) target bundleno = 7 (0x7), region = 81 }
 0x3cc   : > { %s889_s18 = smov %s882_s28 }
 0x3cf   :  { %372 = vsyncpa [#allocation4], 1 }
 0x3d0   :  { %374 = vsyncpa [#allocation4 + $0x1], 1 }
 0x3d1   :  { %375 = vsyncpa [#allocation5], 1 }
 0x3d2   :  { %377 = vsyncpa [#allocation5 + $0x1], 1 }

</bundles_post_ra>
